<compile_context>
chip_gen: v6e
topology: v6e:2x2x1
jax: 0.10.0
libtpu: 0.0.40
codegen_flags: <defaults>
</compile_context>

<pallas_src>
import jax
import jax.numpy as jnp
from jax.experimental import pallas as pl
from jax.experimental.pallas import tpu as pltpu


def _round_up(x, m):
    return ((x + m - 1) // m) * m


def _padded_bytes(rows, cols, itemsize=4):
    # VMEM layout pads the last dim to 128 lanes, second-to-last to 8 sublanes.
    return _round_up(rows, 8) * _round_up(cols, 128) * itemsize


def _vmem_capacity_bytes():
    # 128 MiB on v5e/v6e, 64 MiB per TensorCore on v7x.
    try:
        info = pltpu.get_tpu_info()
        cap = getattr(info, "vmem_capacity_bytes", None)
        if cap:
            return int(cap)
    except Exception:
        pass
    return 64 * 1024 * 1024  # conservative fallback (v7x per-core figure)


def ffn_kernel(x_ref, w1_ref, b1_ref, w2_ref, b2_ref, o_ref):
    # x_ref: (C, TN), w1_ref: (HID, C), b1_ref: (HID, 1),
    # w2_ref: (C, HID) (BN-scaled), b2_ref: (C, 1) (BN-folded), o_ref: (C, TN)
    # NOTE: every op below is independent per spatial column; this is what
    # makes the ragged (masked-store) edge tile safe.
    x = x_ref[...].astype(jnp.float32)

    # fc1 (pointwise conv == per-voxel matmul over channels) + bias
    h = jnp.dot(w1_ref[...], x, preferred_element_type=jnp.float32) + b1_ref[...]

    # SwigLU activation from the module: x * sigmoid(1.3 * x)
    h = h * jax.nn.sigmoid(1.3 * h)

    # fc2 + bias with BatchNorm3d (eval) pre-folded into the weights/bias.
    y = jnp.dot(w2_ref[...], h, preferred_element_type=jnp.float32) + b2_ref[...]

    # Dropout3d in eval mode == identity.
    o_ref[...] = y.astype(o_ref.dtype)


def feed_forward_pallas(x_ncdhw, params, *, max_tile_n=32768):
    """x_ncdhw: (B, C, D, H, W) float32. Returns same shape/dtype (eval mode)."""
    w1, b1, w2, b2, gamma, beta, run_mean, run_var, eps = params
    B, C, D, H, W = x_ncdhw.shape
    HID = w1.shape[0]  # Conv3d weight (HID, C, 1, 1, 1) collapsed to (HID, C)
    S = D * H * W

    # Fold BN running stats into fc2 (eval-mode BatchNorm3d).
    scale = gamma / jnp.sqrt(run_var + eps)                  # (C,)
    shift = beta - run_mean * scale                          # (C,)
    w2_scaled = w2 * scale[:, None]                          # (C, HID)
    b2_folded = (b2 * scale + shift).reshape(C, 1)           # (C, 1)
    b1_r = b1.reshape(HID, 1)                                # (HID, 1)

    # Free reshape: NCDHW -> (B, C, S); no transposes anywhere in the wrapper.
    x3d = x_ncdhw.reshape(B, C, S)

    # ---- Tile sizing: lane axis = spatial axis, pick the biggest TN that fits.
    itemsize = 4  # f32
    cap = _vmem_capacity_bytes()
    vmem_limit = max(32 << 20, min(int(cap * 0.75), cap - (8 << 20)))

    # Resident weights/biases still get double-buffered by the pipeline.
    weight_bytes = 2 * (_padded_bytes(HID, C) + _padded_bytes(HID, 1)
                        + _padded_bytes(C, HID) + _padded_bytes(C, 1))
    # Per spatial column: double-buffered x + out tiles, plus ~2 HID-tall f32
    # intermediates (pre-activation and activated hidden).
    bytes_per_col = itemsize * (2 * _round_up(C, 8)        # x tile (dbuf)
                                + 2 * _round_up(C, 8)      # out tile (dbuf)
                                + 2 * _round_up(HID, 8))   # hidden temps
    tile_budget = vmem_limit - weight_bytes - (2 << 20)    # headroom
    max_tn = max(128, (max(tile_budget, 0) // bytes_per_col) // 128 * 128)

    if S < 128:
        tn = S                               # tiny input: block == full dim
    else:
        s_cap = (S // 128) * 128             # largest 128-multiple tile <= S
        tn = max(128, min(s_cap, max_tn, _round_up(max_tile_n, 128)))
        # v7x shards the "parallel" grid axes across 2 TensorCores: make sure
        # there are at least ~4 programs so neither core idles.  The extra
        # grid steps are negligible on 1-TC v5e/v6e.
        while B * pl.cdiv(S, tn) < 4 and tn > 128:
            tn = max(128, _round_up(tn // 2, 128))

    grid = (B, pl.cdiv(S, tn))   # ragged last spatial block handled by Pallas

    weight_io_bytes = itemsize * (HID * C + C * HID + HID + C)
    cost = pl.CostEstimate(
        flops=4 * B * S * C * HID,                    # two C x HID matmuls
        transcendentals=B * S * HID,                  # sigmoid
        bytes_accessed=2 * B * C * S * itemsize + weight_io_bytes,
    )

    out3d = pl.pallas_call(
        ffn_kernel,
        out_shape=jax.ShapeDtypeStruct((B, C, S), x_ncdhw.dtype),
        grid_spec=pltpu.PrefetchScalarGridSpec(
            num_scalar_prefetch=0,
            grid=grid,
            in_specs=[
                # x tile: (C, TN), batch dim squeezed out
                pl.BlockSpec((None, C, tn), lambda b, j: (b, 0, j)),
                pl.BlockSpec((HID, C), lambda b, j: (0, 0)),      # W1 (resident)
                pl.BlockSpec((HID, 1), lambda b, j: (0, 0)),      # b1
                pl.BlockSpec((C, HID), lambda b, j: (0, 0)),      # W2 * bn_scale
                pl.BlockSpec((C, 1), lambda b, j: (0, 0)),        # b2 folded
            ],
            out_specs=pl.BlockSpec((None, C, tn), lambda b, j: (b, 0, j)),
        ),
        compiler_params=pltpu.CompilerParams(
            dimension_semantics=("parallel", "parallel"),
            vmem_limit_bytes=int(vmem_limit),
        ),
        cost_estimate=cost,
    )(x3d, w1, b1_r, w2_scaled, b2_folded)

    return out3d.reshape(B, C, D, H, W)


def make_params(key, channels, expand_ratio=2):
    hidden = channels * expand_ratio
    k1, k2, k3, k4, k5, k6, k7, k8 = jax.random.split(key, 8)
    fan_in1 = channels
    fan_in2 = hidden
    w1 = jax.random.uniform(k1, (hidden, channels), jnp.float32,
                            -1.0 / jnp.sqrt(fan_in1), 1.0 / jnp.sqrt(fan_in1))
    b1 = jax.random.uniform(k2, (hidden,), jnp.float32,
                            -1.0 / jnp.sqrt(fan_in1), 1.0 / jnp.sqrt(fan_in1))
    w2 = jax.random.uniform(k3, (channels, hidden), jnp.float32,
                            -1.0 / jnp.sqrt(fan_in2), 1.0 / jnp.sqrt(fan_in2))
    b2 = jax.random.uniform(k4, (channels,), jnp.float32,
                            -1.0 / jnp.sqrt(fan_in2), 1.0 / jnp.sqrt(fan_in2))
    # BatchNorm3d params + (non-trivial) running stats
    gamma = 1.0 + 0.1 * jax.random.normal(k5, (channels,), jnp.float32)
    beta = 0.1 * jax.random.normal(k6, (channels,), jnp.float32)
    run_mean = 0.1 * jax.random.normal(k7, (channels,), jnp.float32)
    run_var = 1.0 + 0.1 * jax.random.uniform(k8, (channels,), jnp.float32)
    eps = 1e-5
    return (w1, b1, w2, b2, gamma, beta, run_mean, run_var, eps)


def feed_forward_ref(x_ncdhw, params):
    """Pure-JAX reference of the same eval-mode forward pass."""
    w1, b1, w2, b2, gamma, beta, run_mean, run_var, eps = params
    x = jnp.transpose(x_ncdhw, (0, 2, 3, 4, 1))            # (B,D,H,W,C)
    h = jnp.einsum('bdhwc,oc->bdhwo', x, w1) + b1
    h = h * jax.nn.sigmoid(1.3 * h)
    y = jnp.einsum('bdhwo,co->bdhwc', h, w2) + b2
    y = (y - run_mean) / jnp.sqrt(run_var + eps) * gamma + beta
    return jnp.transpose(y, (0, 4, 1, 2, 3))


if __name__ == "__main__":
    key = jax.random.PRNGKey(0)
    k_x, k_p = jax.random.split(key)

    # channels=4, expand_ratio=2 -> hidden=8; S = 4*8*8 = 256 (>=128 => lane-dense)
    B, C, D, H, W = 2, 4, 4, 8, 8
    x = jax.random.normal(k_x, (B, C, D, H, W), jnp.float32)
    params = make_params(k_p, channels=C, expand_ratio=2)

    out = feed_forward_pallas(x, params)
    out = jax.block_until_ready(out)

    ref = feed_forward_ref(x, params)
    assert out.shape == x.shape
    assert jnp.allclose(out, ref, atol=1e-4, rtol=1e-4), "mismatch vs reference"

    print("KERNEL_OK")
</pallas_src>

<mosaic_0001>
module attributes {stable_mosaic.version = 11 : i64} {
  func.func @ffn_kernel(%arg0: i32, %arg1: i32, %arg2: memref<1x4x128xf32, #tpu.memory_space<vmem>>, %arg3: memref<8x4xf32, #tpu.memory_space<vmem>>, %arg4: memref<8x1xf32, #tpu.memory_space<vmem>>, %arg5: memref<4x8xf32, #tpu.memory_space<vmem>>, %arg6: memref<4x1xf32, #tpu.memory_space<vmem>>, %arg7: memref<1x4x128xf32, #tpu.memory_space<vmem>>) attributes {dimension_semantics = [#tpu.dimension_semantics<parallel>, #tpu.dimension_semantics<parallel>], iteration_bounds = array<i64: 2, 2>, scalar_prefetch = 0 : i64, scratch_operands = 0 : i64, tpu.core_type = #tpu.core_type<tc>, window_params = [{transform_indices = @transform_0, window_bounds = array<i64: 1, 4, 128>}, {pipeline_mode = #tpu.pipeline_mode<synchronous>, transform_indices = @transform_1, window_bounds = array<i64: 8, 4>}, {pipeline_mode = #tpu.pipeline_mode<synchronous>, transform_indices = @transform_2, window_bounds = array<i64: 8, 1>}, {pipeline_mode = #tpu.pipeline_mode<synchronous>, transform_indices = @transform_3, window_bounds = array<i64: 4, 8>}, {pipeline_mode = #tpu.pipeline_mode<synchronous>, transform_indices = @transform_4, window_bounds = array<i64: 4, 1>}, {transform_indices = @transform_5, window_bounds = array<i64: 1, 4, 128>}]} {
    %c0 = arith.constant 0 : index
    %c0_0 = arith.constant 0 : index
    %c0_1 = arith.constant 0 : index
    %0 = vector.load %arg2[%c0, %c0_0, %c0_1] : memref<1x4x128xf32, #tpu.memory_space<vmem>>, vector<1x4x128xf32>
    %1 = vector.shape_cast %0 : vector<1x4x128xf32> to vector<4x128xf32>
    %c0_2 = arith.constant 0 : index
    %c0_3 = arith.constant 0 : index
    %2 = vector.load %arg3[%c0_2, %c0_3] : memref<8x4xf32, #tpu.memory_space<vmem>>, vector<8x4xf32>
    %cst = arith.constant dense<0.000000e+00> : vector<8x128xf32>
    %3 = tpu.matmul %2, %1, %cst {dimension_numbers = #tpu.dot_dimension_numbers<[1], [0], [0], [1], [0, 0, 1, 1], [], []>} : vector<8x4xf32>, vector<4x128xf32>, vector<8x128xf32> -> vector<8x128xf32>
    %c0_4 = arith.constant 0 : index
    %c0_5 = arith.constant 0 : index
    %4 = vector.load %arg4[%c0_4, %c0_5] : memref<8x1xf32, #tpu.memory_space<vmem>>, vector<8x1xf32>
    %5 = vector.broadcast %4 : vector<8x1xf32> to vector<8x128xf32>
    %6 = arith.addf %3, %5 : vector<8x128xf32>
    %cst_6 = arith.constant 1.300000e+00 : f32
    %7 = vector.broadcast %cst_6 : f32 to vector<8x128xf32>
    %8 = arith.mulf %7, %6 : vector<8x128xf32>
    %9 = arith.negf %8 : vector<8x128xf32>
    %10 = math.exp %9 : vector<8x128xf32>
    %cst_7 = arith.constant 1.000000e+00 : f32
    %11 = vector.broadcast %cst_7 : f32 to vector<8x128xf32>
    %12 = arith.addf %11, %10 : vector<8x128xf32>
    %13 = arith.divf %11, %12 : vector<8x128xf32>
    %14 = arith.mulf %6, %13 : vector<8x128xf32>
    %c0_8 = arith.constant 0 : index
    %c0_9 = arith.constant 0 : index
    %15 = vector.load %arg5[%c0_8, %c0_9] : memref<4x8xf32, #tpu.memory_space<vmem>>, vector<4x8xf32>
    %cst_10 = arith.constant dense<0.000000e+00> : vector<4x128xf32>
    %16 = tpu.matmul %15, %14, %cst_10 {dimension_numbers = #tpu.dot_dimension_numbers<[1], [0], [0], [1], [0, 0, 1, 1], [], []>} : vector<4x8xf32>, vector<8x128xf32>, vector<4x128xf32> -> vector<4x128xf32>
    %c0_11 = arith.constant 0 : index
    %c0_12 = arith.constant 0 : index
    %17 = vector.load %arg6[%c0_11, %c0_12] : memref<4x1xf32, #tpu.memory_space<vmem>>, vector<4x1xf32>
    %18 = vector.broadcast %17 : vector<4x1xf32> to vector<4x128xf32>
    %19 = arith.addf %16, %18 : vector<4x128xf32>
    %c0_13 = arith.constant 0 : index
    %c0_14 = arith.constant 0 : index
    %c0_15 = arith.constant 0 : index
    %20 = vector.load %arg7[%c0_13, %c0_14, %c0_15] : memref<1x4x128xf32, #tpu.memory_space<vmem>>, vector<1x4x128xf32>
    %21 = vector.shape_cast %20 : vector<1x4x128xf32> to vector<4x128xf32>
    %22 = vector.shape_cast %19 : vector<4x128xf32> to vector<1x4x128xf32>
    tpu.vector_store %arg7[%c0_13, %c0_14, %c0_15], %22 {strides = array<i32>} : memref<1x4x128xf32, #tpu.memory_space<vmem>>, vector<1x4x128xf32>,
    return
  }
  func.func @transform_0(%arg0: i32, %arg1: i32) -> (i32, i32, i32) {
    %c0_i32 = arith.constant 0 : i32
    %c0_i32_0 = arith.constant 0 : i32
    return %arg0, %c0_i32, %arg1 : i32, i32, i32
  }
  func.func @transform_1(%arg0: i32, %arg1: i32) -> (i32, i32) {
    %c0_i32 = arith.constant 0 : i32
    %c0_i32_0 = arith.constant 0 : i32
    %c0_i32_1 = arith.constant 0 : i32
    return %c0_i32, %c0_i32_0 : i32, i32
  }
  func.func @transform_2(%arg0: i32, %arg1: i32) -> (i32, i32) {
    %c0_i32 = arith.constant 0 : i32
    %c0_i32_0 = arith.constant 0 : i32
    %c0_i32_1 = arith.constant 0 : i32
    return %c0_i32, %c0_i32_0 : i32, i32
  }
  func.func @transform_3(%arg0: i32, %arg1: i32) -> (i32, i32) {
    %c0_i32 = arith.constant 0 : i32
    %c0_i32_0 = arith.constant 0 : i32
    %c0_i32_1 = arith.constant 0 : i32
    return %c0_i32, %c0_i32_0 : i32, i32
  }
  func.func @transform_4(%arg0: i32, %arg1: i32) -> (i32, i32) {
    %c0_i32 = arith.constant 0 : i32
    %c0_i32_0 = arith.constant 0 : i32
    %c0_i32_1 = arith.constant 0 : i32
    return %c0_i32, %c0_i32_0 : i32, i32
  }
  func.func @transform_5(%arg0: i32, %arg1: i32) -> (i32, i32, i32) {
    %c0_i32 = arith.constant 0 : i32
    %c0_i32_0 = arith.constant 0 : i32
    return %arg0, %c0_i32, %arg1 : i32, i32, i32
  }
}

</mosaic_0001>

<bundles_post_ra>
// kernel: tpu_custom_call.1
= control target key start
LH: loop header
LB: loop body
LE: loop exit
PB: predicated region body
PF: predicated region fallthrough
CT: control target
= control target key end

     0   :  { %10 = vsyncpa [#allocation3], 0  ;;  %s898_s0 = inlined_call_operand.vmem [shape: f32[2,4,256], index: 0, kind: input, shape index: {}]   ;;  %s899_s1 = inlined_call_operand.vmem [shape: f32[8,4], index: 1, kind: input, shape index: {}]   ;;  %s900_s2 = inlined_call_operand.vmem [shape: f32[8,1], index: 2, kind: input, shape index: {}]   ;;  %s901_s3 = inlined_call_operand.vmem [shape: f32[4,8], index: 3, kind: input, shape index: {}]   ;;  %s902_s4 = inlined_call_operand.vmem [shape: f32[4,1], index: 4, kind: input, shape index: {}]   ;;  %s903_s5 = inlined_call_operand.hbm [shape: f32[2,4,256], index: 5, kind: output, shape index: {}]  }
   0x1   :  { %12 = vsyncpa [#allocation3 + $0x1], 0  ;;  %s756_s18 = smov 0   ;;  %s758_s19 = smov 0  }
   0x2   :  { %s760_s20 = smov 0   ;;  %s762_s21 = smov 0  }
   0x3   :  { %s764_s22 = smov 0   ;;  %s766_s23 = smov 0  }
   0x4   :  { %s768_s24 = smov 0   ;;  %s770_s25 = smov 0  }
   0x5 LB: > { %s518_s26 = sadd.s32 4294967295, %s720_s25   ;;  %s519_s27 = sadd.s32 4294967294, %s720_s25   ;;  %s720_s25 = sphi %s770_s25, %s18_s25   ;;  %s716_s24 = sphi %s768_s24, %s912_s24   ;;  %s712_s23 = sphi %s766_s23, %s911_s23   ;;  %s708_s22 = sphi %s764_s22, %s910_s22   ;;  %s704_s21 = sphi %s762_s21, %s909_s21   ;;  %s700_s20 = sphi %s760_s20, %s908_s20   ;;  %s696_s19 = sphi %s758_s19, %s907_s19   ;;  %s692_s18 = sphi %s756_s18, %s906_s18  }
   0x6   : > { %s27_s28 = sadd.s32 1, %s712_s23  ;;  %s30_s29 = sadd.s32 1, %s716_s24 }
   0x7   : > { %p28_p0 = scmp.ge.s32.totalorder %s27_s28, 2  ;;  %p161_p1 = scmp.ne.s32.totalorder %s700_s20, %s696_s19 }
   0x8   : > { %p162_p2 = scmp.eq.s32.totalorder %s518_s26, 3  ;;  %p167_p5 = scmp.ne.s32.totalorder %s696_s19, %s692_s18 }
   0x9   : > { %s914_s28 = smov (%p28_p0, %s27_s28), 0  ;;  %s916_s29 = smov (!%p28_p0, %s30_s29), %s716_s24 }
   0xa   : > { %s147_s30 = ssub.s32 %s712_s23, %s914_s28  ;;  %p807_p3 = por %p162_p2, %p161_p1 }
   0xb   : > { %p32_p4 = scmp.ge.s32.totalorder %s916_s29, 2  ;;  %p168_p6 = scmp.eq.s32.totalorder %s519_s27, 3 }
   0xc   : > { %p522_p7 = scmp.ge.s32.totalorder %s720_s25, 1  ;;  %p209_p9 = scmp.lt.s32.totalorder %s720_s25, 5 }
   0xd   : > { %s918_s29 = smov (%p32_p4, %s916_s29), 0  ;;  %p816_p8 = por %p168_p6, %p167_p5 }
   0xe   : > { %s146_s8 = ssub.s32 %s716_s24, %s918_s29  ;;  %s151_s9 = sadd.s32 1, %s700_s20 }
   0xf   : > { %s148_s10 = sor.u32 %s147_s30, %s146_s8  ;;  %p210_p10 = pnand %p522_p7, %p209_p9 }
  0x10   : > { %p149_p11 = scmp.eq.s32.totalorder %s148_s10, 0  ;;  %p240_p12 = scmp.lt.s32.totalorder (!%p210_p10), %s708_s22, 1 }
  0x11   : > { %213 = sbr.rel (%p210_p10) target bundleno = 470 (0x1d6), region = 40  ;;  %p242_p13 = scmp.lt.s32.totalorder (!%p210_p10), %s704_s21, 1 }
  0x12   : > { %s825_s11 = scalar_select %p149_p11, %s700_s20, %s151_s9  }
  0x13   : > { %s531_s26 = sshll.u32 (!%p210_p10), %s708_s22, 1 }
  0x16   : > { %v722_v0 = vmov 0.0   ;;  %vm723_vm0 = vmmov 0   ;;  %v250_v1 = vld [vmem:[%s900_s2] sm:$0xff]  ;;  %s241_s14 = scalar_select %p240_p12, %s708_s22, 1  ;;  %v724_v2 = vmov 0   ;;  %vm260_vm1 = vcmask 1043456  }
  0x17   : > { %539 = vmatprep.subr.mxu0 %v722_v0  ;;  %541 = vmatprep.mubr.msk.f32.mxu0 %vm723_vm0, %v722_v0  ;;  %s243_s15 = scalar_select %p242_p13, %s704_s21, 1  ;;  %v343_v3 = vld [vmem:[%s902_s4] sm:$0xf]  ;;  %vm256_vm2 = vcmask 31744   ;;  %vm349_vm3 = vcmask 64512  }
  0x18   : > { %623 = vset.pattern.permute.xlu0 %v724_v2  ;;  %544 = vmatprep.subr.mxu1 %v722_v0  ;;  %s524_s16 = sshll.u32 %s241_s14, 1  ;;  %v249_v4 = vld [vmem:[%s899_s1] sm:$0xff] }
  0x19   : > { %253 = vperm.xlu0 %623, %v250_v1   ;;  %546 = vmatprep.mubr.msk.f32.mxu1 %vm723_vm0, %v722_v0  ;;  %s245_s27 = sadd.s32 %s524_s16, %s243_s15  ;;  %v342_v16 = vld [vmem:[%s901_s3] sm:$0xf]  ;;  %s237_s16 = sand.u32 1, %s696_s19  }
  0x1a   : > { %s525_s30 = sshll.u32 %s245_s27, 2  ;;  %s523_s17 = sshll.u32 %s237_s16, 2 }
  0x1b   : > { %s247_s10 = scalar_lea.vmem %s898_s0, %s525_s30  ;;  %s436_s27 = sadd.s32 %s704_s21, %s531_s26 }
  0x1c   : > { %v248_v5 = vld [vmem:[%s247_s10] sm:$0xf]  ;;  %s532_s30 = sshll.u32 %s436_s27, 6  ;;  %s239_s8 = scalar_lea.vmem [#allocation2], %s523_s17 }
  0x1d   : > { %346 = vperm.xlu0 %623, %v343_v3   ;;  %540 = vmatpush3.msk.msra.mxu0 %vm260_vm1, %v248_v5  ;;  %s440_s9 = sshll.u32 %s239_s8, 4  ;;  %s852_s13 = scalar_lea.hbm %s903_s5, %s532_s30  ;;  %s441_s9 = int_to_ptr.vmem [resolvable:$true] %s440_s9 }
  0x1e   : > { %542 = vmatmul.mubr.msk.f32.vlgmr.msra.gmra.mxu0 %vm256_vm2, %v249_v4  ;;  %s425_s14 = scalar_lea.sflag [#allocation3], %s237_s16  ;;  %s628_s15 = scalar_lea.vmem %s441_s9, 64 }
  0x1f   : > { %p629_p0 = scmp.ne.s32.totalorder %s441_s9, %s628_s15  ;;  %s725_s21 = smov [#allocation2]  }
  0x20   : > { %s632_s22 = sshll.u32 %s725_s21, 4  ;;  %s633_s22 = int_to_ptr.vmem [resolvable:$false] %s632_s22 }
  0x21   : > { %p630_p1 = pnand %p629_p0, %p807_p3  ;;  %s634_s17 = scalar_lea.vmem %s633_s22, 128 }
  0x22   : > { %p635_p4 = scmp.lt.s32.totalorder %s441_s9, %s633_s22  ;;  %p636_p5 = scmp.lt.s32.totalorder %s634_s17, %s628_s15 }
  0x23   : > { %p631_p2 = pneg %p630_p1 }
  0x24   : > { %p637_p6 = por %p636_p5, %p635_p4 }
  0x26   : > { %p638_p7 = pnand %p637_p6, %p631_p2 }
  0x94   : > { %v254_v6 = vpop.permute.xlu0 %253 }
  0x98   : > { %v347_v17 = vpop.permute.xlu0 %346 }
  0xde   : > { %v330_v7 = vpop.f32.mrf.mxu0 }
  0xdf   : > { %v331_v8 = vadd.f32 %v330_v7, %v254_v6 }
  0xe0   : > { %v543_v9 = vpop.f32.mrf.mxu0 }
  0xe1   : > { %v528_v10 = vmul.f32 -1.3, %v331_v8 }
  0xe3   : > { %v336_v11 = vmul.f32 1.442695, %v528_v10 }
  0xe5   : > { %624 = vpow2.f32 %v336_v11 }
  0xf2   : > { %v625_v12 = vpop.eup %624 }
  0xf3   : > { %v338_v13 = vadd.f32 1.0, %v625_v12 }
  0xf5   : > { %626 = vrcp.f32 %v338_v13 }
 0x102   : > { %v627_v14 = vpop.eup %626 }
 0x103   : > { %v341_v15 = vmul.f32 %v627_v14, %v331_v8 }
 0x105   : > { %545 = vmatpush3.msra.mxu1 %v341_v15 }
 0x106   : > { %547 = vmatmul.mubr.msk.f32.vlgmr.msra.gmra.mxu1 %vm349_vm3, %v342_v16 }
 0x1c6   : > { %v419_v18 = vpop.f32.mrf.mxu1 }
 0x1c7   : > { %v420_v19 = vadd.f32 %v419_v18, %v347_v17 }
 0x1c8   : > { %v548_v20 = vpop.f32.mrf.mxu1 }
 0x1c9   : > { %423 = vst [vmem:[%s239_s8] sm:$0xf] %v420_v19 }
 0x1ca   : > { %641 = shalt.err (!%p638_p7)
}
 0x1cb   : > { %s642_s26 = scalar_lea.hbm %s852_s13, 64  ;;  %s646_s30 = scalar_lea.hbm %s903_s5, 256 }
 0x1cc   : > { %p643_p9 = scmp.ne.s32.totalorder %s852_s13, %s642_s26  ;;  %p647_p12 = scmp.lt.s32.totalorder %s852_s13, %s903_s5 }
 0x1cd   : > { %p648_p13 = scmp.lt.s32.totalorder %s646_s30, %s642_s26 }
 0x1ce   : > { %p644_p10 = pnand %p643_p9, %p807_p3 }
 0x1cf   : > { %p649_p0 = por %p648_p13, %p647_p12 }
 0x1d0   : > { %p645_p11 = pneg %p644_p10 }
 0x1d2   : > { %p650_p1 = pnand %p649_p0, %p645_p11 }
 0x1d4   : > { %653 = shalt.err (!%p650_p1)
}
 0x1d5   : > { %549 = dma.vmem_to_hbm [thread:$0]  (%p807_p3), %s441_s9, 64, %s852_s13, %s425_s14  }
 0x1d6 PF: > { %p555_p2 = scmp.ge.s32.totalorder %s720_s25, 2  ;;  %s452_s12 = sand.u32 1, %s692_s18  }
 0x1d7   : > { %s453_s15 = scalar_lea.sflag [#allocation3], %s452_s12 }
 0x1d8   : > { %p552_p4 = pnand %p555_p2, %p816_p8 }
 0x1da   : > { %p553_p5 = pneg %p552_p4 }
 0x1dc   : > { %687 = dma.done.wait (%p553_p5), %s453_s15, 64  }
 0x1dd   : > { %689 = vsyncadd (%p553_p5), %s453_s15, 4294967232  ;;  %s18_s25 = sadd.s32 1, %s720_s25   ;;  %s906_s18 = smov %s696_s19 }
 0x1de   : > { %p15_p6 = scmp.ge.s32.totalorder %s18_s25, 6   ;;  %s907_s19 = smov %s700_s20 }
 0x1df   : > { %s908_s20 = smov %s825_s11  ;;  %s909_s21 = smov %s712_s23 }
 0x1e0   : > { %s910_s22 = smov %s716_s24  ;;  %s911_s23 = smov %s914_s28 }
 0x1e1   : > { %s912_s24 = smov %s918_s29  ;;  %17 = sbr.rel (!%p15_p6) target bundleno = 5 (0x5), region = 75 }
 0x1e6   :  { %458 = vsyncpa [#allocation3], 1 }
 0x1e7   :  { %460 = vsyncpa [#allocation3 + $0x1], 1 }

</bundles_post_ra>
